<compile_context>
chip_gen: v7x
topology: tpu7x:2x2x1
jax: 0.10.0
libtpu: 0.0.40
codegen_flags: <defaults>
</compile_context>

<pallas_src>
import functools

import jax
import jax.numpy as jnp
from jax import lax
from jax.experimental import pallas as pl
from jax.experimental.pallas import tpu as pltpu


def _round_up(x, m):
    return ((x + m - 1) // m) * m


def _pairwise_reg_kernel(ti_ref, tj_ref, w_ref, zi_ref, zj_ref, out_ref,
                         acc_ref, *, n, tm, mxu_dtype, eup_dtype):
    """Sum of log1p(pdist) over one (ti, tj) tile of the pairwise matrix.

    Grid is (core_slab, tile_step).  acc_ref is an (8, tm) per-lane f32
    accumulator private to the slab; the per-slab partial is written to
    out_ref only on the slab's last step.
    """
    c = pl.program_id(0)
    t = pl.program_id(1)

    @pl.when(t == 0)
    def _init():
        acc_ref[...] = jnp.zeros_like(acc_ref)

    ti = ti_ref[c, t]                      # row-tile index
    tj = tj_ref[c, t]                      # col-tile index (tj >= ti)
    w = w_ref[c, t].astype(jnp.float32)    # 1 diag, 2 off-diag, 0 padding

    zi = zi_ref[...].astype(jnp.float32)   # (tm, d) rows
    zj = zj_ref[...].astype(jnp.float32)   # (tm, d) cols

    # Pairwise squared distances: ||x||^2 + ||y||^2 - 2 x.y
    sq_i = jnp.sum(zi * zi, axis=-1, keepdims=True)          # (tm, 1), f32
    sq_j = jnp.sum(zj * zj, axis=-1, keepdims=True)          # (tm, 1), f32
    zj_m2 = zj * (-2.0)                                      # pre-scale O(tm*d)
    gram_m2 = lax.dot_general(                               # (tm, tm) on MXU
        zi.astype(mxu_dtype), zj_m2.astype(mxu_dtype),
        dimension_numbers=(((1,), (1,)), ((), ())),
        preferred_element_type=jnp.float32)
    d2 = jnp.maximum(sq_i + jnp.transpose(sq_j) + gram_m2, 0.0)

    # Transcendental chain (the binding EUP work); optionally bf16 on v6e/v7x.
    v = jnp.log1p(jnp.sqrt(d2.astype(eup_dtype))).astype(jnp.float32)

    # Mask AFTER the transcendentals: padded rows/cols and the diagonal drop
    # out via a free VPU select (robust to sqrt(0) lowering).
    rows = ti * tm + lax.broadcasted_iota(jnp.int32, (tm, tm), 0)
    cols = tj * tm + lax.broadcasted_iota(jnp.int32, (tm, tm), 1)
    mask = (rows < n) & (cols < n) & (rows != cols)
    v = jnp.where(mask, v, 0.0)

    # Per-lane accumulation: reduce only along the grouped-row axis (pure VALU
    # vreg adds, no cross-lane XLU work, no SMEM round-trip).
    partial = jnp.sum(v.reshape(tm // 8, 8, tm), axis=0)     # (8, tm)
    acc_ref[...] = acc_ref[...] + w * partial

    @pl.when(t == pl.num_programs(1) - 1)
    def _finalize():
        out_ref[0] = acc_ref[...]


def energy_function(Z, Z_prev, lambda_reg=1.0, *, row_tile=512,
                    mxu_dtype=jnp.bfloat16, eup_dtype=jnp.float32,
                    num_core_slabs=2):
    """Pallas TPU implementation of EnergyFunction.forward."""
    n, d = Z.shape
    assert Z_prev.shape == (n, d)

    # Reconstruction loss is O(N*D) and XLA-fusable: keep it outside the kernel.
    recon = jnp.mean((Z.astype(jnp.float32) - Z_prev.astype(jnp.float32)) ** 2)

    # Row tile: multiple of 8 (sublane constraint); pad N up to a multiple.
    tm = min(int(row_tile), _round_up(n, 8))
    n_pad = _round_up(n, tm)
    Zp = jnp.pad(Z, ((0, n_pad - n), (0, 0))) if n_pad != n else Z
    ni = n_pad // tm

    # Upper-triangle tile schedule (j >= i) split across `num_core_slabs`
    # slabs by whole rows (greedy balance on row workload ni - i).  Whole-row
    # assignment keeps constant-ti runs, so the Z row tile is not re-DMA'd.
    core_rows = [[] for _ in range(num_core_slabs)]
    core_work = [0] * num_core_slabs
    for i in range(ni):                       # workload ni - i is descending
        c = min(range(num_core_slabs), key=lambda k: core_work[k])
        core_rows[c].append(i)
        core_work[c] += ni - i

    sched = []
    for c in range(num_core_slabs):
        ti_l, tj_l, w_l = [], [], []
        for i in core_rows[c]:
            for j in range(i, ni):
                ti_l.append(i)
                tj_l.append(j)
                w_l.append(1 if i == j else 2)   # symmetry: off-diag counted 2x
        sched.append((ti_l, tj_l, w_l))
    num_steps = max(1, max(len(s[0]) for s in sched))

    def _pad(lst, fill):
        return lst + [fill] * (num_steps - len(lst))

    ti_ids = jnp.asarray([_pad(s[0], 0) for s in sched], dtype=jnp.int32)
    tj_ids = jnp.asarray([_pad(s[1], 0) for s in sched], dtype=jnp.int32)
    w_ids = jnp.asarray([_pad(s[2], 0) for s in sched], dtype=jnp.int32)

    kernel = functools.partial(
        _pairwise_reg_kernel, n=n, tm=tm, mxu_dtype=mxu_dtype,
        eup_dtype=eup_dtype)

    grid_spec = pltpu.PrefetchScalarGridSpec(
        num_scalar_prefetch=3,
        grid=(num_core_slabs, num_steps),
        in_specs=[
            # Z row tile and Z column tile (same HBM array, two block views).
            pl.BlockSpec((tm, d), lambda c, t, ti, tj, w: (ti[c, t], 0),
                         memory_space=pltpu.VMEM),
            pl.BlockSpec((tm, d), lambda c, t, ti, tj, w: (tj[c, t], 0),
                         memory_space=pltpu.VMEM),
        ],
        # Per-slab partial (lane-parallel) output; summed outside the kernel.
        out_specs=pl.BlockSpec((1, 8, tm), lambda c, t, ti, tj, w: (c, 0, 0),
                               memory_space=pltpu.VMEM),
        scratch_shapes=[pltpu.VMEM((8, tm), jnp.float32)],
    )

    cost = pl.CostEstimate(
        flops=2 * n * n * d + 8 * n * n,
        transcendentals=2 * n * n,            # sqrt + log1p over the pair matrix
        bytes_accessed=2 * n * d * 4 + 2 * 8 * tm * 4,
    )

    partials = pl.pallas_call(
        kernel,
        out_shape=jax.ShapeDtypeStruct((num_core_slabs, 8, tm), jnp.float32),
        grid_spec=grid_spec,
        compiler_params=pltpu.CompilerParams(
            # Core-slab axis is independent (per-slab accumulator + output
            # block) -> "parallel" so v7x megacore can shard it; the tile axis
            # carries the accumulator -> "arbitrary".
            dimension_semantics=("parallel", "arbitrary"),
            vmem_limit_bytes=32 * 1024 * 1024,
        ),
        cost_estimate=cost,
    )(ti_ids, tj_ids, w_ids, Zp, Zp)

    reg = jnp.sum(partials) * (1.0 / (n * n))
    return recon + jnp.float32(lambda_reg) * reg


def energy_function_ref(Z, Z_prev, lambda_reg=1.0):
    """Pure-JAX reference matching the PyTorch semantics."""
    recon = jnp.mean((Z - Z_prev) ** 2)
    d2 = jnp.sum((Z[:, None, :] - Z[None, :, :]) ** 2, axis=-1)
    pdist = jnp.sqrt(jnp.maximum(d2, 0.0))
    reg = jnp.mean(jnp.log1p(pdist))
    return recon + lambda_reg * reg


if __name__ == "__main__":
    key = jax.random.PRNGKey(0)
    k1, k2, k3, k4 = jax.random.split(key, 4)

    # Primary small case (graph-node representations: N nodes, D hidden).
    N, D = 64, 32
    Z = jax.random.normal(k1, (N, D), dtype=jnp.float32)
    Z_prev = Z + 0.1 * jax.random.normal(k2, (N, D), dtype=jnp.float32)

    # Default config: bf16 MXU operands, f32 transcendentals.
    out = jax.block_until_ready(energy_function(Z, Z_prev, 1.0))
    ref = energy_function_ref(Z, Z_prev, 1.0)
    assert jnp.allclose(out, ref, rtol=2e-3, atol=2e-3), (out, ref)

    # Fully f32 config must match the reference tightly.
    out_f32 = jax.block_until_ready(
        energy_function(Z, Z_prev, 1.0, mxu_dtype=jnp.float32,
                        eup_dtype=jnp.float32))
    assert jnp.allclose(out_f32, ref, rtol=1e-4, atol=1e-4), (out_f32, ref)

    # bf16 EUP path (the v6e/v7x transcendental lever); looser tolerance.
    out_bf16 = jax.block_until_ready(
        energy_function(Z, Z_prev, 1.0, eup_dtype=jnp.bfloat16))
    assert jnp.allclose(out_bf16, ref, rtol=3e-2, atol=3e-2), (out_bf16, ref)

    # Multi-tile case: exercises the triangle schedule, the 2-slab split,
    # padding and masking.
    N2, D2 = 200, 32
    Z2 = jax.random.normal(k3, (N2, D2), dtype=jnp.float32)
    Z2_prev = Z2 + 0.1 * jax.random.normal(k4, (N2, D2), dtype=jnp.float32)
    out2 = jax.block_until_ready(
        energy_function(Z2, Z2_prev, 0.5, row_tile=64))
    ref2 = energy_function_ref(Z2, Z2_prev, 0.5)
    assert jnp.allclose(out2, ref2, rtol=2e-3, atol=2e-3), (out2, ref2)

    # Same multi-tile case with the default (larger) tile size.
    out3 = jax.block_until_ready(energy_function(Z2, Z2_prev, 0.5))
    assert jnp.allclose(out3, ref2, rtol=2e-3, atol=2e-3), (out3, ref2)

    print("KERNEL_OK")
</pallas_src>

<mosaic_0001>
module attributes {stable_mosaic.version = 11 : i64} {
  func.func @_pairwise_reg_kernel(%arg0: i32, %arg1: i32, %arg2: memref<2x1xi32, #tpu.memory_space<smem>>, %arg3: memref<2x1xi32, #tpu.memory_space<smem>>, %arg4: memref<2x1xi32, #tpu.memory_space<smem>>, %arg5: memref<64x32xf32, #tpu.memory_space<vmem>>, %arg6: memref<64x32xf32, #tpu.memory_space<vmem>>, %arg7: memref<1x8x64xf32, #tpu.memory_space<vmem>>, %arg8: memref<8x64xf32, #tpu.memory_space<vmem>>) attributes {dimension_semantics = [#tpu.dimension_semantics<parallel>, #tpu.dimension_semantics<arbitrary>], iteration_bounds = array<i64: 2, 1>, scalar_prefetch = 3 : i64, scratch_operands = 1 : i64, tpu.core_type = #tpu.core_type<tc>, window_params = [{transform_indices = @transform_0, window_bounds = array<i64: 64, 32>}, {transform_indices = @transform_1, window_bounds = array<i64: 64, 32>}, {transform_indices = @transform_2, window_bounds = array<i64: 1, 8, 64>}]} {
    %c0_i32 = arith.constant 0 : i32
    %0 = arith.cmpi eq, %arg1, %c0_i32 : i32
    %1 = arith.extui %0 : i1 to i32
    %c0_i32_0 = arith.constant 0 : i32
    %2 = arith.cmpi ne, %1, %c0_i32_0 : i32
    scf.if %2 {
      %cst_19 = arith.constant 0.000000e+00 : f32
      %62 = vector.broadcast %cst_19 : f32 to vector<8x64xf32>
      %c0_20 = arith.constant 0 : index
      %c0_21 = arith.constant 0 : index
      %63 = vector.load %arg8[%c0_20, %c0_21] : memref<8x64xf32, #tpu.memory_space<vmem>>, vector<8x64xf32>
      tpu.vector_store %arg8[%c0_20, %c0_21], %62 {strides = array<i32>} : memref<8x64xf32, #tpu.memory_space<vmem>>, vector<8x64xf32>,
    } else {
    }
    %3 = arith.index_cast %arg0 : i32 to index
    %4 = arith.index_cast %arg1 : i32 to index
    %5 = memref.load %arg2[%3, %4] : memref<2x1xi32, #tpu.memory_space<smem>>
    %6 = arith.index_cast %arg0 : i32 to index
    %7 = arith.index_cast %arg1 : i32 to index
    %8 = memref.load %arg3[%6, %7] : memref<2x1xi32, #tpu.memory_space<smem>>
    %9 = arith.index_cast %arg0 : i32 to index
    %10 = arith.index_cast %arg1 : i32 to index
    %11 = memref.load %arg4[%9, %10] : memref<2x1xi32, #tpu.memory_space<smem>>
    %12 = arith.sitofp %11 : i32 to f32
    %c0 = arith.constant 0 : index
    %c0_1 = arith.constant 0 : index
    %13 = vector.load %arg5[%c0, %c0_1] : memref<64x32xf32, #tpu.memory_space<vmem>>, vector<64x32xf32>
    %c0_2 = arith.constant 0 : index
    %c0_3 = arith.constant 0 : index
    %14 = vector.load %arg6[%c0_2, %c0_3] : memref<64x32xf32, #tpu.memory_space<vmem>>, vector<64x32xf32>
    %15 = arith.mulf %13, %13 : vector<64x32xf32>
    %cst = arith.constant dense<0.000000e+00> : vector<64xf32>
    %16 = vector.multi_reduction <add>, %15, %cst [1] : vector<64x32xf32> to vector<64xf32>
    %17 = vector.shape_cast %16 : vector<64xf32> to vector<64x1xf32>
    %18 = arith.mulf %14, %14 : vector<64x32xf32>
    %cst_4 = arith.constant dense<0.000000e+00> : vector<64xf32>
    %19 = vector.multi_reduction <add>, %18, %cst_4 [1] : vector<64x32xf32> to vector<64xf32>
    %20 = vector.shape_cast %19 : vector<64xf32> to vector<64x1xf32>
    %cst_5 = arith.constant -2.000000e+00 : f32
    %21 = vector.broadcast %cst_5 : f32 to vector<64x32xf32>
    %22 = arith.mulf %14, %21 : vector<64x32xf32>
    %23 = arith.truncf %13 : vector<64x32xf32> to vector<64x32xbf16>
    %24 = arith.truncf %22 : vector<64x32xf32> to vector<64x32xbf16>
    %cst_6 = arith.constant dense<0.000000e+00> : vector<64x64xf32>
    %25 = tpu.matmul %23, %24, %cst_6 {dimension_numbers = #tpu.dot_dimension_numbers<[1], [1], [0], [0], [0, 0, 1, 0], [], []>} : vector<64x32xbf16>, vector<64x32xbf16>, vector<64x64xf32> -> vector<64x64xf32>
    %26 = tpu.transpose %20, [1, 0] : vector<64x1xf32> -> vector<1x64xf32>
    %27 = vector.broadcast %17 : vector<64x1xf32> to vector<64x64xf32>
    %28 = vector.broadcast %26 : vector<1x64xf32> to vector<64x64xf32>
    %29 = arith.addf %27, %28 : vector<64x64xf32>
    %30 = arith.addf %29, %25 : vector<64x64xf32>
    %cst_7 = arith.constant 0.000000e+00 : f32
    %31 = vector.broadcast %cst_7 : f32 to vector<64x64xf32>
    %32 = arith.maximumf %30, %31 : vector<64x64xf32>
    %33 = math.sqrt %32 : vector<64x64xf32>
    %34 = math.log1p %33 : vector<64x64xf32>
    %c64_i32 = arith.constant 64 : i32
    %35 = arith.muli %5, %c64_i32 : i32
    %36 = tpu.iota {dimensions = array<i32: 0>} : vector<64x64xi32>
    %37 = vector.broadcast %35 : i32 to vector<64x64xi32>
    %38 = arith.addi %37, %36 : vector<64x64xi32>
    %c64_i32_8 = arith.constant 64 : i32
    %39 = arith.muli %8, %c64_i32_8 : i32
    %40 = tpu.iota {dimensions = array<i32: 1>} : vector<64x64xi32>
    %41 = vector.broadcast %39 : i32 to vector<64x64xi32>
    %42 = arith.addi %41, %40 : vector<64x64xi32>
    %c64_i32_9 = arith.constant 64 : i32
    %43 = vector.broadcast %c64_i32_9 : i32 to vector<64x64xi32>
    %44 = arith.cmpi slt, %38, %43 : vector<64x64xi32>
    %c64_i32_10 = arith.constant 64 : i32
    %45 = vector.broadcast %c64_i32_10 : i32 to vector<64x64xi32>
    %46 = arith.cmpi slt, %42, %45 : vector<64x64xi32>
    %47 = arith.andi %44, %46 : vector<64x64xi1>
    %48 = arith.cmpi ne, %38, %42 : vector<64x64xi32>
    %49 = arith.andi %47, %48 : vector<64x64xi1>
    %cst_11 = arith.constant 0.000000e+00 : f32
    %50 = vector.broadcast %cst_11 : f32 to vector<64x64xf32>
    %51 = arith.select %49, %34, %50 : vector<64x64xi1>, vector<64x64xf32>
    %52 = vector.shape_cast %51 : vector<64x64xf32> to vector<8x8x64xf32>
    %cst_12 = arith.constant dense<0.000000e+00> : vector<8x64xf32>
    %53 = vector.multi_reduction <add>, %52, %cst_12 [0] : vector<8x8x64xf32> to vector<8x64xf32>
    %c0_13 = arith.constant 0 : index
    %c0_14 = arith.constant 0 : index
    %54 = vector.load %arg8[%c0_13, %c0_14] : memref<8x64xf32, #tpu.memory_space<vmem>>, vector<8x64xf32>
    %55 = vector.broadcast %12 : f32 to vector<8x64xf32>
    %56 = arith.mulf %55, %53 : vector<8x64xf32>
    %57 = arith.addf %54, %56 : vector<8x64xf32>
    %c0_15 = arith.constant 0 : index
    %c0_16 = arith.constant 0 : index
    %58 = vector.load %arg8[%c0_15, %c0_16] : memref<8x64xf32, #tpu.memory_space<vmem>>, vector<8x64xf32>
    tpu.vector_store %arg8[%c0_15, %c0_16], %57 {strides = array<i32>} : memref<8x64xf32, #tpu.memory_space<vmem>>, vector<8x64xf32>,
    %c0_i32_17 = arith.constant 0 : i32
    %59 = arith.cmpi eq, %arg1, %c0_i32_17 : i32
    %60 = arith.extui %59 : i1 to i32
    %c0_i32_18 = arith.constant 0 : i32
    %61 = arith.cmpi ne, %60, %c0_i32_18 : i32
    scf.if %61 {
      %c0_19 = arith.constant 0 : index
      %c0_20 = arith.constant 0 : index
      %62 = vector.load %arg8[%c0_19, %c0_20] : memref<8x64xf32, #tpu.memory_space<vmem>>, vector<8x64xf32>
      %c0_21 = arith.constant 0 : index
      %c0_22 = arith.constant 0 : index
      %c0_23 = arith.constant 0 : index
      %63 = vector.load %arg7[%c0_21, %c0_22, %c0_23] : memref<1x8x64xf32, #tpu.memory_space<vmem>>, vector<1x8x64xf32>
      %64 = vector.shape_cast %63 : vector<1x8x64xf32> to vector<8x64xf32>
      %65 = vector.shape_cast %62 : vector<8x64xf32> to vector<1x8x64xf32>
      tpu.vector_store %arg7[%c0_21, %c0_22, %c0_23], %65 {strides = array<i32>} : memref<1x8x64xf32, #tpu.memory_space<vmem>>, vector<1x8x64xf32>,
    } else {
    }
    return
  }
  func.func @transform_0(%arg0: i32, %arg1: i32, %arg2: memref<2x1xi32, #tpu.memory_space<smem>>, %arg3: memref<2x1xi32, #tpu.memory_space<smem>>, %arg4: memref<2x1xi32, #tpu.memory_space<smem>>) -> (i32, i32) {
    %0 = arith.index_cast %arg0 : i32 to index
    %1 = arith.index_cast %arg1 : i32 to index
    %2 = memref.load %arg2[%0, %1] : memref<2x1xi32, #tpu.memory_space<smem>>
    %c0_i32 = arith.constant 0 : i32
    %c0_i32_0 = arith.constant 0 : i32
    return %2, %c0_i32 : i32, i32
  }
  func.func @transform_1(%arg0: i32, %arg1: i32, %arg2: memref<2x1xi32, #tpu.memory_space<smem>>, %arg3: memref<2x1xi32, #tpu.memory_space<smem>>, %arg4: memref<2x1xi32, #tpu.memory_space<smem>>) -> (i32, i32) {
    %0 = arith.index_cast %arg0 : i32 to index
    %1 = arith.index_cast %arg1 : i32 to index
    %2 = memref.load %arg3[%0, %1] : memref<2x1xi32, #tpu.memory_space<smem>>
    %c0_i32 = arith.constant 0 : i32
    %c0_i32_0 = arith.constant 0 : i32
    return %2, %c0_i32 : i32, i32
  }
  func.func @transform_2(%arg0: i32, %arg1: i32, %arg2: memref<2x1xi32, #tpu.memory_space<smem>>, %arg3: memref<2x1xi32, #tpu.memory_space<smem>>, %arg4: memref<2x1xi32, #tpu.memory_space<smem>>) -> (i32, i32, i32) {
    %c0_i32 = arith.constant 0 : i32
    %c0_i32_0 = arith.constant 0 : i32
    %c0_i32_1 = arith.constant 0 : i32
    return %arg0, %c0_i32, %c0_i32_0 : i32, i32, i32
  }
}

</mosaic_0001>

<bundles_post_ra>
// kernel: tpu_custom_call.1
= control target key start
LH: loop header
LB: loop body
LE: loop exit
PB: predicated region body
PF: predicated region fallthrough
CT: control target
= control target key end

     0   :  { %s1694_s0 = inlined_call_operand.vmem [shape: s32[2,1], index: 0, kind: input, shape index: {}]   ;;  %s1695_s3 = inlined_call_operand.vmem [shape: f32[64,32], index: 3, kind: input, shape index: {}]   ;;  %s1696_s4 = inlined_call_operand.vmem [shape: f32[64,32], index: 4, kind: input, shape index: {}]   ;;  %s1697_s5 = inlined_call_operand.hbm [shape: f32[2,8,64], index: 5, kind: output, shape index: {}]   ;;  %s1698_s1 = inlined_call_operand.vmem [shape: s32[2,1], index: 1, kind: input, shape index: {}]   ;;  %s1699_s2 = inlined_call_operand.vmem [shape: s32[2,1], index: 2, kind: input, shape index: {}]  }
   0x1   :  { %s10_s20 = sshll.u32 %s1694_s0, 4  ;;  %s14_s23 = sshll.u32 %s1698_s1, 4  ;;  %s11_s20 = int_to_ptr.vmem [resolvable:$true] %s10_s20  ;;  %s15_s23 = int_to_ptr.vmem [resolvable:$true] %s14_s23 }
   0x2   :  { %s1041_s24 = scalar_lea.vmem %s11_s20, 32  ;;  %p1046_p1 = scmp.lt.s32.totalorder %s11_s20, %s11_s20 }
   0x3   :  { %p1042_p0 = scmp.ne.s32.totalorder %s11_s20, %s1041_s24  ;;  %p1047_p2 = scmp.lt.s32.totalorder %s1041_s24, %s1041_s24 }
   0x5   :  { %p1048_p3 = por %p1047_p2, %p1046_p1 }
   0x7   :  { %p1049_p4 = pnand %p1048_p3, %p1042_p0 }
   0x9   :  { %1052 = shalt.err (!%p1049_p4)  }
   0xa   :  { %s1159_s25 = smov [#allocation4]   ;;  %s1053_s26 = scalar_lea.vmem %s15_s23, 32 }
   0xb   :  { %13 = dma.vmem_to_smem %s11_s20, 32, %s1159_s25, [#allocation3] }
   0xc   :  { %p1054_p5 = scmp.ne.s32.totalorder %s15_s23, %s1053_s26  ;;  %p1058_p6 = scmp.lt.s32.totalorder %s15_s23, %s15_s23 }
   0xd   :  { %p1059_p7 = scmp.lt.s32.totalorder %s1053_s26, %s1053_s26 }
   0xf   :  { %p1060_p8 = por %p1059_p7, %p1058_p6 }
  0x11   :  { %p1061_p9 = pnand %p1060_p8, %p1054_p5 }
  0x13   :  { %1064 = shalt.err (!%p1061_p9)  }
  0x14   :  { %s1160_s0 = smov [#allocation5]   ;;  %s18_s28 = sshll.u32 %s1699_s2, 4  ;;  %s19_s28 = int_to_ptr.vmem [resolvable:$true] %s18_s28 }
  0x15   :  { %17 = dma.vmem_to_smem %s15_s23, 32, %s1160_s0, [#allocation3] }
  0x16   :  { %s1065_s29 = scalar_lea.vmem %s19_s28, 32  ;;  %p1070_p11 = scmp.lt.s32.totalorder %s19_s28, %s19_s28 }
  0x17   :  { %p1066_p10 = scmp.ne.s32.totalorder %s19_s28, %s1065_s29  ;;  %p1071_p12 = scmp.lt.s32.totalorder %s1065_s29, %s1065_s29 }
  0x19   :  { %p1072_p13 = por %p1071_p12, %p1070_p11 }
  0x1b   :  { %p1073_p0 = pnand %p1072_p13, %p1066_p10 }
  0x1d   :  { %1076 = shalt.err (!%p1073_p0)  }
  0x1e   :  { %s1161_s30 = smov [#allocation6]  }
  0x1f   :  { %21 = dma.vmem_to_smem %s19_s28, 32, %s1161_s30, [#allocation3] }
  0x20   :  { %1129 = dma.done.wait [#allocation3], 96 }
  0x21   :  { %1130 = vsyncadd [#allocation3], 4294967200 }
  0x22   :  { %23 = sfence }
  0x23   :  { %24 = vsyncpa [#allocation8], 0 }
  0x24   :  { %26 = vsyncpa [#allocation8 + $0x1], 0  ;;  %s1203_s6 = smov 0   ;;  %s1205_s7 = smov 0  }
  0x25   :  { %s1207_s2 = smov 0   ;;  %s1209_s8 = smov 0  }
  0x26   :  { %s1211_s9 = smov 0   ;;  %s1213_s10 = smov 0  }
  0x27 LB: > { %s883_s11 = sadd.s32 4294967295, %s1157_s10   ;;  %s884_s12 = sadd.s32 4294967294, %s1157_s10   ;;  %s1157_s10 = sphi %s1213_s10, %s32_s10   ;;  %s1153_s9 = sphi %s1211_s9, %s1741_s9   ;;  %s1149_s8 = sphi %s1209_s8, %s1740_s8   ;;  %s1145_s2 = sphi %s1207_s2, %s1739_s2   ;;  %s1141_s7 = sphi %s1205_s7, %s1738_s7   ;;  %s1137_s6 = sphi %s1203_s6, %s1737_s6  }
  0x28   : > { %s44_s13 = sadd.s32 1, %s1153_s9  ;;  %s135_s14 = sadd.s32 1, %s1145_s2 }
  0x29   : > { %p46_p1 = scmp.ge.s32.totalorder %s44_s13, 2  ;;  %p145_p2 = scmp.ne.s32.totalorder %s1145_s2, %s1141_s7 }
  0x2a   : > { %p146_p3 = scmp.eq.s32.totalorder %s883_s11, 1  ;;  %p151_p4 = scmp.ne.s32.totalorder %s1141_s7, %s1137_s6 }
  0x2b   : > { %s1743_s13 = smov (%p46_p1, %s44_s13), 0  ;;  %p152_p6 = scmp.eq.s32.totalorder %s884_s12, 1 }
  0x2c   : > { %p1241_p5 = por %p146_p3, %p145_p2  ;;  %s132_s16 = ssub.s32 %s1153_s9, %s1743_s13 }
  0x2d   : > { %p891_p7 = scmp.ge.s32.totalorder %s1157_s10, 1  ;;  %p133_p8 = scmp.eq.s32.totalorder %s132_s16, 0 }
  0x2e   : > { %p1248_p9 = por %p152_p6, %p151_p4  ;;  %p220_p10 = scmp.lt.s32.totalorder %s1157_s10, 3 }
  0x2f   : > { %s1254_s18 = scalar_select %p133_p8, %s1145_s2, %s135_s14  }
  0x30   : > { %p221_p11 = pnand %p891_p7, %p220_p10 }
  0x31   : > { %s1256_s19 = sshll.u32 (!%p221_p11), %s1149_s8, 7  ;;  %vm349_vm0 = vcmask (!%p221_p11), 261120   ;;  %vm1700_vm1 = vcmask (!%p221_p11), 523264   ;;  %s1163_s27 = smov (!%p221_p11), [#allocation7]  }
  0x32   : > { %224 = sbr.rel (%p221_p11) target bundleno = 427 (0x1ab), region = 28  ;;  %s292_s20 = sld [smem:[#allocation5 + %s1256_s19]] (!%p221_p11) }
  0x33   : > { %s270_s21 = sld [smem:[#allocation4 + %s1256_s19]] (!%p221_p11)  ;;  %s1646_s26 = scalar_lea.hbm (!%p221_p11), %s1697_s5, %s1256_s19 }
  0x34   : > { %s1323_s30 = sld [smem:[#allocation4 + %s1256_s19]] (!%p221_p11)  ;;  %s1081_s28 = sshll.u32 (!%p221_p11), %s1163_s27, 4  ;;  %s1082_s28 = int_to_ptr.vmem [resolvable:$false] %s1081_s28 }
  0x35   : > { %s1326_s8 = sld [smem:[#allocation5 + %s1256_s19]] (!%p221_p11) }
  0x36   : > { %s1610_s14 = sld [smem:[#allocation6 + %s1256_s19]] (!%p221_p11) }
  0x38   : > { %s897_s22 = sshll.u32 (!%p221_p11), %s292_s20, 3  ;;  %s260_s20 = sand.u32 (!%p221_p11), 1, %s1141_s7  }
  0x39   : > { %p294_p12 = scmp.lt.s32.totalorder %s897_s22, 7  ;;  %s894_s23 = sshll.u32 %s270_s21, 3 }
  0x3a   : > { %p272_p13 = scmp.lt.s32.totalorder %s894_s23, 7  ;;  %s904_s11 = sshll.u32 %s1323_s30, 6 }
  0x3b   : > { %s1745_s22 = smov (!%p294_p12, %s897_s22), 7  ;;  %s905_s12 = sshll.u32 %s1326_s8, 6 }
  0x3c   : > { %s898_s24 = sshll.u32 %s1745_s22, 3  ;;  %s1747_s23 = smov (!%p272_p13, %s894_s23), 7 }
  0x3d   : > { %s1263_s0 = scalar_lea.vmem %s1696_s4, %s898_s24  ;;  %s895_s1 = sshll.u32 %s1747_s23, 3 }
  0x3e   : > { %v333_v0 = vld [vmem:[%s1263_s0] sm:$0xff]  ;;  %v334_v1 = vld [vmem:[%s1263_s0 + $0x8] sm:$0xff]  ;;  %v335_v2 = vld [vmem:[%s1263_s0 + $0x10] sm:$0xff]  ;;  %s1275_s29 = scalar_lea.vmem %s1695_s3, %s895_s1  ;;  %s324_s16 = scvt.s32.f32 %s1610_s14 }
  0x3f   : > { %v374_v3 = vmul.f32 %v333_v0, %v333_v0  ;;  %v406_v4 = vmul.f32 -2.0, %v333_v0  ;;  %v375_v5 = vmul.f32 %v334_v1, %v334_v1  ;;  %v407_v6 = vmul.f32 -2.0, %v334_v1  ;;  %v336_v7 = vld [vmem:[%s1263_s0 + $0x18] sm:$0xff]  ;;  %v337_v12 = vld [vmem:[%s1263_s0 + $0x20] sm:$0xff]  ;;  %v338_v14 = vld [vmem:[%s1263_s0 + $0x28] sm:$0xff]  ;;  %s892_s21 = sshll.u32 %s260_s20, 3 }
  0x40   : > { %v376_v8 = vmul.f32 %v335_v2, %v335_v2  ;;  %v408_v9 = vmul.f32 -2.0, %v335_v2  ;;  %v377_v10 = vmul.f32 %v336_v7, %v336_v7  ;;  %v409_v11 = vmul.f32 -2.0, %v336_v7  ;;  %v325_v16 = vld [vmem:[%s1275_s29] sm:$0xff]  ;;  %v326_v17 = vld [vmem:[%s1275_s29 + $0x8] sm:$0xff]  ;;  %v339_v23 = vld [vmem:[%s1263_s0 + $0x30] sm:$0xff]  ;;  %s262_s22 = scalar_lea.vmem [#allocation7], %s892_s21 }
  0x41   : > { %v382_v13 = vsel %vm349_vm0, %v374_v3, 0.0  ;;  %v385_v18 = vsel %vm349_vm0, %v375_v5, 0.0  ;;  %v378_v19 = vmul.f32 %v337_v12, %v337_v12  ;;  %v379_v22 = vmul.f32 %v338_v14, %v338_v14  ;;  %v329_v25 = vld [vmem:[%s1275_s29 + $0x20] sm:$0xff]  ;;  %v330_v26 = vld [vmem:[%s1275_s29 + $0x28] sm:$0xff]  ;;  %v340_v27 = vld [vmem:[%s1263_s0 + $0x38] sm:$0xff]  ;;  %s804_s23 = sshll.u32 %s262_s22, 4  ;;  %s1648_s23 = int_to_ptr.vmem [resolvable:$true] %s804_s23 }
  0x42   : > { %383 = vadd.xlane.f32.xlu0 %v382_v13  ;;  %v388_v15 = vsel %vm349_vm0, %v376_v8, 0.0  ;;  %v391_v20 = vsel %vm349_vm0, %v377_v10, 0.0  ;;  %v419_v21 = vpack.c.bf16 %v409_v11, %v408_v9  ;;  %v418_v24 = vpack.c.bf16 %v407_v6, %v406_v4  ;;  %v327_v43 = vld [vmem:[%s1275_s29 + $0x10] sm:$0xff]  ;;  %v328_v44 = vld [vmem:[%s1275_s29 + $0x18] sm:$0xff]  ;;  %s791_s0 = scalar_lea.sflag [#allocation8], %s260_s20  ;;  %s1077_s1 = scalar_lea.vmem %s1648_s23, 128 }
  0x43   : > { %389 = vadd.xlane.f32.xlu1 %v388_v15  ;;  %v414_v28 = vpack.c.bf16 %v326_v17, %v325_v16  ;;  %v394_v30 = vsel %vm349_vm0, %v378_v19, 0.0  ;;  %v380_v31 = vmul.f32 %v339_v23, %v339_v23  ;;  %v416_v32 = vpack.c.bf16 %v330_v26, %v329_v25  ;;  %v331_v57 = vld [vmem:[%s1275_s29 + $0x30] sm:$0xff]  ;;  %v332_v58 = vld [vmem:[%s1275_s29 + $0x38] sm:$0xff]  ;;  %p1078_p0 = scmp.ne.s32.totalorder %s1648_s23, %s1077_s1  ;;  %s1083_s29 = scalar_lea.vmem %s1082_s28, 256 }
  0x44   : > { %942 = vmatprep.subr.msk.bf16.mxu0 %vm349_vm0, %v418_v24  ;;  %v435_v29 = vsel %vm349_vm0, %v418_v24, 0  ;;  %v410_v33 = vmul.f32 -2.0, %v337_v12  ;;  %v397_v34 = vsel %vm349_vm0, %v379_v22, 0.0  ;;  %v411_v35 = vmul.f32 -2.0, %v338_v14  ;;  %943 = vmatprep.subr.msk.bf16.mxu1 %vm349_vm0, %v418_v24  ;;  %p1084_p3 = scmp.lt.s32.totalorder %s1648_s23, %s1082_s28  ;;  %p1085_p4 = scmp.lt.s32.totalorder %s1083_s29, %s1077_s1 }
  0x45   : > { %919 = vmatpush3.bf16.xpose.msra.mxu0 %v435_v29  ;;  %v381_v36 = vmul.f32 %v340_v27, %v340_v27  ;;  %938 = vmatpush3.bf16.xpose.msra.mxu1 %v435_v29  ;;  %v400_v37 = vsel %vm349_vm0, %v380_v31, 0.0  ;;  %v341_v38 = vmul.f32 %v325_v16, %v325_v16  ;;  %v438_v41 = vsel %vm349_vm0, %v419_v21, 0  ;;  %p1079_p1 = pnand %p1078_p0, %p1241_p5 }
  0x46   : > { %386 = vadd.xlane.f32.xlu0 %v385_v18  ;;  %944 = vmatprep.subr.msk.bf16.mxu0 %vm349_vm0, %v419_v21  ;;  %v420_v39 = vpack.c.bf16 %v411_v35, %v410_v33  ;;  %v342_v42 = vmul.f32 %v326_v17, %v326_v17  ;;  %v343_v46 = vmul.f32 %v327_v43, %v327_v43  ;;  %v412_v47 = vmul.f32 -2.0, %v339_v23  ;;  %p1086_p6 = por %p1085_p4, %p1084_p3 }
  0x47   : > { %392 = vadd.xlane.f32.xlu1 %v391_v20  ;;  %926 = vmatprep.mubr.msk.bf16.mxu0 %vm349_vm0, %v414_v28  ;;  %v403_v40 = vsel %vm349_vm0, %v381_v36, 0.0  ;;  %v350_v45 = vsel %vm349_vm0, %v341_v38, 0.0  ;;  %v413_v48 = vmul.f32 -2.0, %v340_v27  ;;  %v344_v50 = vmul.f32 %v328_v44, %v328_v44  ;;  %p1080_p2 = pneg %p1079_p1 }
  0x48   : > { %945 = vmatprep.subr.msk.bf16.mxu1 %vm349_vm0, %v419_v21  ;;  %930 = vmatprep.mubr.msk.bf16.mxu1 %vm349_vm0, %v416_v32  ;;  %v353_v49 = vsel %vm349_vm0, %v342_v42, 0.0  ;;  %v356_v51 = vsel %vm349_vm0, %v343_v46, 0.0  ;;  %v345_v52 = vmul.f32 %v329_v25, %v329_v25  ;;  %v441_v54 = vsel %vm349_vm0, %v420_v39, 0 }
  0x49   : > { %v421_v53 = vpack.c.bf16 %v413_v48, %v412_v47  ;;  %v359_v55 = vsel %vm349_vm0, %v344_v50, 0.0  ;;  %v346_v56 = vmul.f32 %v330_v26, %v330_v26  ;;  %v347_v60 = vmul.f32 %v331_v57, %v331_v57  ;;  %p1087_p7 = pnand %p1086_p6, %p1080_p2 }
  0x4a   : > { %395 = vadd.xlane.f32.xlu0 %v394_v30  ;;  %v362_v59 = vsel %vm349_vm0, %v345_v52, 0.0  ;;  %v348_v62 = vmul.f32 %v332_v58, %v332_v58  ;;  %v415_v2 = vpack.c.bf16 %v328_v44, %v327_v43  ;;  %v417_v3 = vpack.c.bf16 %v332_v58, %v331_v57 }
  0x4b   : > { %398 = vadd.xlane.f32.xlu1 %v397_v34  ;;  %v365_v61 = vsel %vm349_vm0, %v346_v56, 0.0  ;;  %v368_v63 = vsel %vm349_vm0, %v347_v60, 0.0  ;;  %v444_v0 = vsel %vm349_vm0, %v421_v53, 0  ;;  %v1162_v12 = vmov 0.0  }
  0x4c   : > { %v371_v1 = vsel %vm349_vm0, %v348_v62, 0.0  ;;  %313 = vst.msk [vmem:[#allocation2] sm:$0xff] %vm1700_vm1, %v1162_v12  ;;  %v543_v23 = vlaneseq }
  0x4d   : > { %921 = vmatpush3.bf16.xpose.msra.mxu0 %v438_v41  ;;  %939 = vmatpush3.bf16.xpose.msra.mxu1 %v438_v41 }
  0x4e   : > { %401 = vadd.xlane.f32.xlu0 %v400_v37  ;;  %946 = vmatprep.subr.msk.bf16.mxu0 %vm349_vm0, %v420_v39  ;;  %v1319_v26 = vshrl.u32 %v543_v23, 7 }
  0x4f   : > { %404 = vadd.xlane.f32.xlu1 %v403_v40  ;;  %947 = vmatprep.subr.msk.bf16.mxu1 %vm349_vm0, %v420_v39 }
  0x50   : > { %v545_v29 = vsub.s32 0, %v1319_v26  ;;  %v702_v56 = vadd.s32 8, %v1319_v26  ;;  %v703_v58 = vadd.s32 16, %v1319_v26  ;;  %v704_v60 = vadd.s32 24, %v1319_v26 }
  0x51   : > { %v705_v62 = vadd.s32 32, %v1319_v26 }
  0x52   : > { %351 = vadd.xlane.f32.xlu0 %v350_v45 }
  0x53   : > { %354 = vadd.xlane.f32.xlu1 %v353_v49 }
  0x55   : > { %923 = vmatpush3.bf16.xpose.msra.mxu0 %v441_v54  ;;  %940 = vmatpush3.bf16.xpose.msra.mxu1 %v441_v54  ;;  %v1341_v54 = vstv %s904_s11 }
  0x56   : > { %357 = vadd.xlane.f32.xlu0 %v356_v51  ;;  %948 = vmatprep.subr.msk.bf16.mxu0 %vm349_vm0, %v421_v53 }
  0x57   : > { %360 = vadd.xlane.f32.xlu1 %v359_v55  ;;  %949 = vmatprep.subr.msk.bf16.mxu1 %vm349_vm0, %v421_v53  ;;  %v720_v53 = vand.u32 127, %v543_v23  ;;  %v721_v55 = vstv %s905_s12 }
  0x5a   : > { %363 = vadd.xlane.f32.xlu0 %v362_v59  ;;  %v707_v59 = vadd.s32 48, %v1319_v26 }
  0x5b   : > { %366 = vadd.xlane.f32.xlu1 %v365_v61 }
  0x5d   : > { %925 = vmatpush3.bf16.xpose.msra.mxu0 %v444_v0  ;;  %941 = vmatpush3.bf16.xpose.msra.mxu1 %v444_v0  ;;  %v1351_v0 = vadd.s32 %v721_v55, %v720_v53 }
  0x5e   : > { %369 = vadd.xlane.f32.xlu0 %v368_v63 }
  0x5f   : > { %372 = vadd.xlane.f32.xlu1 %v371_v1  ;;  %v1355_v1 = vadd.s32 %v1341_v54, %v1319_v26  ;;  %vm731_vm9 = vcmp.lt.s32.totalorder %v1351_v0, 64 }
  0x61   : > { %vm723_vm8 = vcmp.lt.s32.totalorder %v1355_v1, 64  ;;  %vm740_vm14 = vcmp.ne.s32.totalorder %v1355_v1, %v1351_v0 }
  0x64   : > { %927 = vmatmul.mubr.msk.bf16.vlgmr.msra.gmra.mrb[0].mxu0 %vm349_vm0, %v415_v2  ;;  %931 = vmatmul.mubr.msk.bf16.vlgmr.msra.gmra.mrb[0].mxu1 %vm349_vm0, %v417_v3  ;;  %v1358_v2 = vadd.s32 %v1341_v54, %v702_v56  ;;  %v1362_v3 = vadd.s32 %v1341_v54, %v703_v58 }
  0x66   : > { %vm724_vm10 = vcmp.lt.s32.totalorder %v1358_v2, 64  ;;  %vm725_vm13 = vcmp.lt.s32.totalorder %v1362_v3, 64 }
  0xcf   : > { %v384_v4 = vpop.xlane.xlu0 %383 }
  0xd0   : > { %511 = vxpose.xlu0.b32.start [1/8] (short) (narrow) %v384_v4, 8  ;;  %v390_v6 = vpop.xlane.xlu1 %389  ;;  %v1365_v4 = vadd.s32 %v1341_v54, %v707_v59 }
  0xd3   : > { %v387_v5 = vpop.xlane.xlu0 %386 }
  0xd4   : > { %512 = vxpose.xlu0.b32.cont [2/8] (short) (narrow) %v387_v5, 8  ;;  %v393_v7 = vpop.xlane.xlu1 %392  ;;  %v1368_v5 = vadd.s32 %v1341_v54, %v704_v60 }
  0xd7   : > { %v396_v8 = vpop.xlane.xlu0 %395 }
  0xd8   : > { %513 = vxpose.xlu0.b32.cont [3/8] (short) (narrow) %v390_v6, 8  ;;  %v399_v9 = vpop.xlane.xlu1 %398 }
  0xdb   : > { %v402_v10 = vpop.xlane.xlu0 %401 }
  0xdc   : > { %514 = vxpose.xlu0.b32.cont [4/8] (short) (narrow) %v393_v7, 8  ;;  %v405_v11 = vpop.xlane.xlu1 %404 }
  0xdf   : > { %v352_v14 = vpop.xlane.xlu0 %351 }
  0xe0   : > { %515 = vxpose.xlu0.b32.cont [5/8] (short) (narrow) %v396_v8, 8  ;;  %v355_v24 = vpop.xlane.xlu1 %354  ;;  %v1373_v8 = vadd.s32 %v1341_v54, %v705_v62 }
  0xe3   : > { %v358_v22 = vpop.xlane.xlu0 %357 }
  0xe4   : > { %516 = vxpose.xlu0.b32.cont [6/8] (short) (narrow) %v399_v9, 8  ;;  %v361_v27 = vpop.xlane.xlu1 %360  ;;  %v1376_v9 = vadd.s32 56, %v1319_v26 }
  0xe7   : > { %v364_v25 = vpop.xlane.xlu0 %363 }
  0xe8   : > { %517 = vxpose.xlu0.b32.cont [7/8] (short) (narrow) %v402_v10, 8  ;;  %v367_v31 = vpop.xlane.xlu1 %366 }
  0xeb   : > { %v370_v28 = vpop.xlane.xlu0 %369 }
  0xec   : > { %518 = vxpose.xlu0.b32.end [8/8] (short) (narrow) %v405_v11, 8  ;;  %v373_v47 = vpop.xlane.xlu1 %372 }
 0x137   : > { %v928_v13 = vpop.f32.mrb[0].mxu0  ;;  %v932_v17 = vpop.f32.mrb[0].mxu1 }
 0x138   : > { %v480_v15 = vpop.f32.mrb[1].mxu0  ;;  %v496_v19 = vpop.f32.mrb[1].mxu1 }
 0x139   : > { %v929_v16 = vpop.f32.mrb[2].mxu0  ;;  %v933_v20 = vpop.f32.mrb[2].mxu1 }
 0x13a   : > { %v483_v18 = vpop.f32.mrb[3].mxu0  ;;  %v499_v21 = vpop.f32.mrb[3].mxu1 }
 0x150   : > { %v527_v30 = vpop.trf.xlu0 }
 0x151   : > { %v546_v32 = vrot.slane %v527_v30, %v545_v29 }
 0x153   : > { %v547_v33 = vadd.f32 %v546_v32, %v352_v14  ;;  %v549_v34 = vadd.f32 %v546_v32, %v358_v22  ;;  %v550_v35 = vadd.f32 %v546_v32, %v361_v27  ;;  %v548_v36 = vadd.f32 %v546_v32, %v355_v24 }
 0x154   : > { %v553_v37 = vadd.f32 %v546_v32, %v370_v28  ;;  %v551_v38 = vadd.f32 %v546_v32, %v364_v25  ;;  %v554_v50 = vadd.f32 %v546_v32, %v373_v47  ;;  %v552_v52 = vadd.f32 %v546_v32, %v367_v31 }
 0x155   : > { %v555_v39 = vadd.f32 %v547_v33, %v480_v15  ;;  %v557_v40 = vadd.f32 %v928_v13, %v549_v34  ;;  %v558_v41 = vadd.f32 %v929_v16, %v550_v35  ;;  %v556_v42 = vadd.f32 %v548_v36, %v483_v18 }
 0x156   : > { %v561_v46 = vadd.f32 %v932_v17, %v553_v37  ;;  %v559_v49 = vadd.f32 %v551_v38, %v496_v19  ;;  %v562_v61 = vadd.f32 %v933_v20, %v554_v50  ;;  %v560_v63 = vadd.f32 %v552_v52, %v499_v21 }
 0x157   : > { %v563_v43 = vmax.f32 %v555_v39, 0.0  ;;  %v1328_v44 = vmax.f32 %v557_v40, 0.0  ;;  %v1330_v45 = vmax.f32 %v558_v41, 0.0  ;;  %v1332_v48 = vmax.f32 %v556_v42, 0.0 }
 0x158   : > { %v1338_v51 = vmax.f32 %v561_v46, 0.0  ;;  %v1344_v57 = vmax.f32 %v559_v49, 0.0  ;;  %v1370_v6 = vmax.f32 %v562_v61, 0.0  ;;  %v1378_v10 = vmax.f32 %v560_v63, 0.0 }
 0x159   : > { %1009 = vrsqrt.f32 %v563_v43  ;;  %vm573_vm2 = vcmp.eq.f32.partialorder %v563_v43, inf  ;;  %vm575_vm3 = vcmp.eq.f32.partialorder %v563_v43, 0.0  ;;  %v576_v13 = vand.u32 2147483648, %v563_v43 }
 0x15a   : > { %1011 = vrsqrt.f32 %v1328_v44  ;;  %vm580_vm4 = vcmp.eq.f32.partialorder %v1332_v48, inf  ;;  %vm582_vm5 = vcmp.eq.f32.partialorder %v1332_v48, 0.0  ;;  %v583_v15 = vand.u32 2147483648, %v1332_v48 }
 0x15b   : > { %1013 = vrsqrt.f32 %v1330_v45  ;;  %vm587_vm6 = vcmp.eq.f32.partialorder %v1328_v44, inf  ;;  %vm589_vm7 = vcmp.eq.f32.partialorder %v1328_v44, 0.0  ;;  %v590_v19 = vand.u32 2147483648, %v1328_v44 }
 0x15c   : > { %1015 = vrsqrt.f32 %v1332_v48  ;;  %vm615_vm11 = vcmp.eq.f32.partialorder %v1338_v51, inf  ;;  %vm617_vm12 = vcmp.eq.f32.partialorder %v1338_v51, 0.0  ;;  %v618_v29 = vand.u32 2147483648, %v1338_v51 }
 0x15d   : > { %1017 = vrsqrt.f32 %v1338_v51  ;;  %vm594_vm15 = vcmp.eq.f32.partialorder %v1330_v45, inf  ;;  %vm596_vm0 = vcmp.eq.f32.partialorder %v1330_v45, 0.0  ;;  %v597_v35 = vand.u32 2147483648, %v1330_v45 }
 0x15e   : > { %1019 = vrsqrt.f32 %v1344_v57  ;;  %v604_v37 = vand.u32 2147483648, %v1344_v57  ;;  %vm624_vm1 = vcmp.eq.f32.partialorder %v1370_v6, 0.0  ;;  %v625_v52 = vand.u32 2147483648, %v1370_v6 }
 0x15f   : > { %1021 = vrsqrt.f32 %v1370_v6 }
 0x160   : > { %1023 = vrsqrt.f32 %v1378_v10 }
 0x163   : > { %v1010_v7 = vpop.eup %1009 }
 0x164   : > { %v1012_v11 = vpop.eup %1011  ;;  %v572_v12 = vmul.f32 %v1010_v7, %v563_v43 }
 0x165   : > { %v1014_v14 = vpop.eup %1013  ;;  %v586_v16 = vmul.f32 %v1012_v11, %v1328_v44 }
 0x166   : > { %v1016_v17 = vpop.eup %1015  ;;  %v574_v18 = vsel %vm573_vm2, %v563_v43, %v572_v12  ;;  %v593_v30 = vmul.f32 %v1014_v14, %v1330_v45  ;;  %vm741_vm2 = vcmp.ne.s32.totalorder %v1358_v2, %v1351_v0 }
 0x167   : > { %v1388_v20 = vsel %vm575_vm3, %v576_v13, %v574_v18  ;;  %v579_v21 = vmul.f32 %v1016_v17, %v1332_v48  ;;  %v588_v22 = vsel %vm587_vm6, %v1328_v44, %v586_v16  ;;  %v1018_v25 = vpop.eup %1017  ;;  %vm601_vm3 = vcmp.eq.f32.partialorder %v1344_v57, inf }
 0x168   : > { %v1395_v23 = vsel %vm589_vm7, %v590_v19, %v588_v22  ;;  %v627_v24 = vadd.f32 1.0, %v1388_v20  ;;  %v1020_v32 = vpop.eup %1019  ;;  %v630_v33 = vmul.f32 -0.5, %v1388_v20  ;;  %v614_v36 = vmul.f32 %v1018_v25, %v1338_v51 }
 0x169   : > { %v581_v27 = vsel %vm580_vm4, %v1332_v48, %v579_v21  ;;  %v645_v28 = vadd.f32 1.0, %v1395_v23  ;;  %vm603_vm4 = vcmp.eq.f32.partialorder %v1344_v57, 0.0  ;;  %v648_v39 = vmul.f32 -0.5, %v1395_v23  ;;  %v1022_v49 = vpop.eup %1021 }
 0x16a   : > { %v1410_v31 = vsel %vm582_vm5, %v583_v15, %v581_v27  ;;  %1025 = vlog2.f32 %v627_v24  ;;  %vm742_vm5 = vcmp.ne.s32.totalorder %v1362_v3, %v1351_v0  ;;  %v595_v40 = vsel %vm594_vm15, %v1330_v45, %v593_v30  ;;  %v1024_v53 = vpop.eup %1023 }
 0x16b   : > { %v636_v34 = vadd.f32 1.0, %v1410_v31  ;;  %1027 = vlog2.f32 %v645_v28  ;;  %v639_v38 = vmul.f32 -0.5, %v1410_v31  ;;  %vm622_vm6 = vcmp.eq.f32.partialorder %v1370_v6, inf }
 0x16c   : > { %v616_v41 = vsel %vm615_vm11, %v1338_v51, %v614_v36  ;;  %v1438_v42 = vsel %vm596_vm0, %v597_v35, %v595_v40  ;;  %v600_v43 = vmul.f32 %v1020_v32, %v1344_v57  ;;  %vm726_vm7 = vcmp.lt.s32.totalorder %v1368_v5, 64  ;;  %vm1466_vm0 = vmand %vm723_vm8, %vm731_vm9 }
 0x16d   : > { %1029 = vlog2.f32 %v636_v34  ;;  %v631_v44 = vadd.f32 1.0, %v630_v33  ;;  %v633_v46 = vand.u32 2147483647, %v1388_v20  ;;  %v1446_v47 = vsel %vm617_vm12, %v618_v29, %v616_v41  ;;  %vm1484_vm8 = vmand %vm724_vm10, %vm731_vm9 }
 0x16e   : > { %v654_v48 = vadd.f32 1.0, %v1438_v42  ;;  %v651_v45 = vand.u32 2147483647, %v1395_v23  ;;  %v602_v50 = vsel %vm601_vm3, %v1344_v57, %v600_v43  ;;  %vm608_vm15 = vcmp.eq.f32.partialorder %v1378_v10, inf  ;;  %vm1497_vm11 = vmand %vm725_vm13, %vm731_vm9 }
 0x16f   : > { %v640_v55 = vadd.f32 1.0, %v639_v38  ;;  %v649_v51 = vadd.f32 1.0, %v648_v39  ;;  %v1458_v56 = vsel %vm603_vm4, %v604_v37, %v602_v50  ;;  %v681_v59 = vadd.f32 1.0, %v1446_v47  ;;  %vm1512_vm13 = vmand %vm1466_vm0, %vm740_vm14 }
 0x170   : > { %1031 = vlog2.f32 %v654_v48  ;;  %v663_v60 = vadd.f32 1.0, %v1458_v56  ;;  %vm610_vm3 = vcmp.eq.f32.partialorder %v1378_v10, 0.0  ;;  %v611_v57 = vand.u32 2147483648, %v1378_v10  ;;  %vm1530_vm14 = vmand %vm1484_vm8, %vm741_vm2 }
 0x171   : > { %v632_v61 = vmul.f32 %v631_v44, %v1388_v20  ;;  %vm1475_vm4 = vcmp.lt.f32.partialorder %v633_v46, 0.0004427343  ;;  %v642_v63 = vand.u32 2147483647, %v1410_v31  ;;  %v657_v11 = vmul.f32 -0.5, %v1438_v42  ;;  %vm750_vm2 = vmand %vm1497_vm11, %vm742_vm5 }
 0x172   : > { %vm1489_vm12 = vcmp.lt.f32.partialorder %v651_v45, 0.0004427343  ;;  %1033 = vlog2.f32 %v663_v60  ;;  %vm744_vm10 = vcmp.ne.s32.totalorder %v1373_v8, %v1351_v0  ;;  %v621_v15 = vmul.f32 %v1022_v49, %v1370_v6 }
 0x173   : > { %v607_v16 = vmul.f32 %v1024_v53, %v1378_v10  ;;  %v641_v19 = vmul.f32 %v640_v55, %v1410_v31  ;;  %v650_v20 = vmul.f32 %v649_v51, %v1395_v23  ;;  %v666_v22 = vmul.f32 -0.5, %v1458_v56 }
 0x174   : > { %v1026_v12 = vpop.eup %1025  ;;  %1035 = vlog2.f32 %v681_v59  ;;  %v623_v25 = vsel %vm622_vm6, %v1370_v6, %v621_v15  ;;  %vm729_vm0 = vcmp.lt.s32.totalorder %v1365_v4, 64  ;;  %v658_v29 = vadd.f32 1.0, %v657_v11  ;;  %vm1558_vm6 = vmand %vm726_vm7, %vm731_vm9 }
 0x175   : > { %v1028_v17 = vpop.eup %1027  ;;  %v629_v18 = vmul.f32 0.6931472, %v1026_v12  ;;  %v609_v23 = vsel %vm608_vm15, %v1378_v10, %v607_v16  ;;  %v1537_v30 = vsel %vm624_vm1, %v625_v52, %v623_v25  ;;  %vm643_vm1 = vcmp.lt.f32.partialorder %v642_v63, 0.0004427343 }
 0x176   : > { %v647_v24 = vmul.f32 0.6931472, %v1028_v17  ;;  %v1541_v31 = vsel %vm610_vm3, %v611_v57, %v609_v23  ;;  %v690_v6 = vadd.f32 1.0, %v1537_v30  ;;  %v660_v10 = vand.u32 2147483647, %v1438_v42 }
 0x177   : > { %v1030_v27 = vpop.eup %1029  ;;  %v635_v1 = vsel %vm1475_vm4, %v632_v61, %v629_v18  ;;  %v667_v34 = vadd.f32 1.0, %v666_v22  ;;  %v706_v3 = vadd.s32 40, %v1319_v26  ;;  %vm1719_vm5 = vcmask 523264  }
 0x178   : > { %v638_v32 = vmul.f32 0.6931472, %v1030_v27  ;;  %v653_v2 = vsel %vm1489_vm12, %v650_v20, %v647_v24  ;;  %v756_v33 = vsel %vm1512_vm13, %v635_v1, 0.0  ;;  %1037 = vlog2.f32 %v690_v6  ;;  %vm1723_vm15 = vmmov %vm1719_vm5 }
 0x179   : > { %v765_v37 = vsel %vm1719_vm5, %v756_v33, 0.0  ;;  %v672_v38 = vadd.f32 1.0, %v1541_v31  ;;  %v758_v41 = vsel %vm750_vm2, %v653_v2, 0.0  ;;  %v659_v43 = vmul.f32 %v658_v29, %v1438_v42  ;;  %vm1725_vm8 = vmmov %vm1719_vm5 }
 0x17a   : > { %v644_v36 = vsel %vm643_vm1, %v641_v19, %v638_v32  ;;  %v1032_v39 = vpop.eup %1031  ;;  %vm1720_vm7 = vcmp.lt.s32.totalorder %v1373_v8, 64  ;;  %v717_v26 = vadd.s32 %v1341_v54, %v1376_v9  ;;  %v669_v49 = vand.u32 2147483647, %v1458_v56  ;;  %vm1726_vm2 = vmmov %vm1719_vm5 }
 0x17b   : > { %v757_v40 = vsel %vm1530_vm14, %v644_v36, 0.0  ;;  %vm1572_vm11 = vmand %vm1720_vm7, %vm731_vm9  ;;  %v656_v48 = vmul.f32 0.6931472, %v1032_v39  ;;  %vm1724_vm12 = vcmp.ne.s32.totalorder %v1368_v5, %v1351_v0  ;;  %1039 = vlog2.f32 %v672_v38 }
 0x17c   : > { %v766_v46 = vsel %vm1723_vm15, %v757_v40, 0.0  ;;  %vm751_vm3 = vmand %vm1558_vm6, %vm1724_vm12  ;;  %v684_v45 = vmul.f32 -0.5, %v1446_v47  ;;  %vm661_vm4 = vcmp.lt.f32.partialorder %v660_v10, 0.0004427343  ;;  %v715_v50 = vadd.s32 %v1341_v54, %v706_v3  ;;  %v1034_v52 = vpop.eup %1033  ;;  %v780_v10 = vld [vmem:[#allocation2] sm:$0xff] }
 0x17d   : > { %v767_v42 = vadd.f32 %v766_v46, %v765_v37  ;;  %v768_v9 = vsel %vm1725_vm8, %v758_v41, 0.0  ;;  %v662_v53 = vsel %vm661_vm4, %v659_v43, %v656_v48  ;;  %v668_v55 = vmul.f32 %v667_v34, %v1458_v56  ;;  %vm752_vm13 = vmand %vm1572_vm11, %vm744_vm10 }
 0x17e   : > { %v693_v51 = vmul.f32 -0.5, %v1537_v30  ;;  %v665_v5 = vmul.f32 0.6931472, %v1034_v52  ;;  %v759_v59 = vsel %vm751_vm3, %v662_v53, 0.0  ;;  %v675_v60 = vmul.f32 -0.5, %v1541_v31  ;;  %v1036_v54 = vpop.eup %1035  ;;  %vm1602_vm6 = vmand %vm729_vm0, %vm731_vm9 }
 0x17f   : > { %v769_v58 = vadd.f32 %v768_v9, %v767_v42  ;;  %vm670_vm14 = vcmp.lt.f32.partialorder %v669_v49, 0.0004427343  ;;  %v770_v57 = vsel %vm1726_vm2, %v759_v59, 0.0  ;;  %v685_v61 = vadd.f32 1.0, %v684_v45  ;;  %vm1729_vm7 = vmmov %vm1726_vm2 }
 0x180   : > { %v671_v56 = vsel %vm670_vm14, %v668_v55, %v665_v5  ;;  %vm728_vm1 = vcmp.lt.s32.totalorder %v715_v50, 64  ;;  %v687_v63 = vand.u32 2147483647, %v1446_v47  ;;  %vm746_vm10 = vcmp.ne.s32.totalorder %v1365_v4, %v1351_v0 }
 0x181   : > { %v771_v62 = vadd.f32 %v770_v57, %v769_v58  ;;  %v760_v7 = vsel %vm752_vm13, %v671_v56, 0.0  ;;  %vm730_vm5 = vcmp.lt.s32.totalorder %v717_v26, 64  ;;  %v683_v11 = vmul.f32 0.6931472, %v1036_v54  ;;  %vm737_vm0 = vmand %vm728_vm1, %vm731_vm9 }
 0x182   : > { %v772_v12 = vsel %vm1729_vm7, %v760_v7, 0.0  ;;  %v694_v13 = vadd.f32 1.0, %v693_v51  ;;  %v676_v14 = vadd.f32 1.0, %v675_v60  ;;  %v1038_v15 = vpop.eup %1037  ;;  %v696_v17 = vand.u32 2147483647, %v1537_v30  ;;  %vm1624_vm15 = vmand %vm1602_vm6, %vm746_vm10 }
 0x183   : > { %v773_v16 = vadd.f32 %v772_v12, %v771_v62  ;;  %v678_v18 = vand.u32 2147483647, %v1541_v31  ;;  %vm745_vm11 = vcmp.ne.s32.totalorder %v715_v50, %v1351_v0  ;;  %v686_v19 = vmul.f32 %v685_v61, %v1446_v47  ;;  %vm739_vm3 = vmand %vm730_vm5, %vm731_vm9 }
 0x184   : > { %v692_v21 = vmul.f32 0.6931472, %v1038_v15  ;;  %vm688_vm12 = vcmp.lt.f32.partialorder %v687_v63, 0.0004427343  ;;  %vm747_vm4 = vcmp.ne.s32.totalorder %v717_v26, %v1351_v0  ;;  %v695_v24 = vmul.f32 %v694_v13, %v1537_v30  ;;  %vm753_vm8 = vmand %vm737_vm0, %vm745_vm11 }
 0x185   : > { %v1040_v22 = vpop.eup %1039  ;;  %v689_v47 = vsel %vm688_vm12, %v686_v19, %v683_v11  ;;  %v677_v25 = vmul.f32 %v676_v14, %v1541_v31  ;;  %vm697_vm13 = vcmp.lt.f32.partialorder %v696_v17, 0.0004427343  ;;  %vm679_vm14 = vcmp.lt.f32.partialorder %v678_v18, 0.0004427343  ;;  %vm755_vm2 = vmand %vm739_vm3, %vm747_vm4 }
 0x186   : > { %v674_v4 = vmul.f32 0.6931472, %v1040_v22  ;;  %v698_v23 = vsel %vm697_vm13, %v695_v24, %v692_v21  ;;  %v762_v1 = vsel %vm1624_vm15, %v689_v47, 0.0  ;;  %vm1732_vm9 = vmmov %vm1729_vm7  ;;  %v781_v33 = vstv %s324_s16 }
 0x187   : > { %v763_v29 = vsel %vm755_vm2, %v698_v23, 0.0  ;;  %vm1733_vm1 = vmmov %vm1729_vm7 }
 0x188   : > { %v680_v27 = vsel %vm679_vm14, %v677_v25, %v674_v4  ;;  %v776_v32 = vsel %vm1733_vm1, %v762_v1, 0.0  ;;  %vm1734_vm6 = vmmov %vm1733_vm1 }
 0x189   : > { %v761_v28 = vsel %vm753_vm8, %v680_v27, 0.0  ;;  %v778_v2 = vsel %vm1734_vm6, %v763_v29, 0.0  ;;  %vm1735_vm10 = vmmov %vm1733_vm1 }
 0x18a   : > { %v774_v0 = vsel %vm1732_vm9, %v761_v28, 0.0  ;;  %vm1736_vm5 = vmmov %vm1733_vm1 }
 0x18b   : > { %v775_v30 = vadd.f32 %v774_v0, %v773_v16 }
 0x18d   : > { %v777_v31 = vadd.f32 %v776_v32, %v775_v30 }
 0x18f   : > { %v779_v6 = vadd.f32 %v778_v2, %v777_v31 }
 0x191   : > { %v782_v34 = vmul.f32 %v781_v33, %v779_v6 }
 0x193   : > { %v783_v35 = vadd.f32 %v782_v34, %v780_v10 }
 0x195   : > { %784 = vst.msk [vmem:[#allocation2] sm:$0xff] %vm1735_vm10, %v783_v35 }
 0x19c   : > { %v788_v3 = vld [vmem:[#allocation2] sm:$0xff] }
 0x19d   : > { %789 = vst.msk [vmem:[%s262_s22] sm:$0xff] %vm1736_vm5, %v788_v3 }
 0x19e   : > { %1090 = shalt.err (!%p1087_p7)
}
 0x19f   : > { %s1091_s19 = scalar_lea.hbm %s1646_s26, 128  ;;  %s1095_s11 = scalar_lea.hbm %s1697_s5, 256 }
 0x1a0   : > { %p1092_p8 = scmp.ne.s32.totalorder %s1646_s26, %s1091_s19  ;;  %p1096_p12 = scmp.lt.u32.totalorder %s1646_s26, %s1697_s5 }
 0x1a1   : > { %p1097_p13 = scmp.lt.u32.totalorder %s1095_s11, %s1091_s19  ;;  %p1099_p1 = scmp.lt.u32.totalorder %s1091_s19, %s1646_s26 }
 0x1a2   : > { %p1093_p10 = pnand %p1092_p8, %p1241_p5 }
 0x1a3   : > { %p1098_p0 = por %p1097_p13, %p1096_p12 }
 0x1a4   : > { %p1094_p11 = pneg %p1093_p10 }
 0x1a5   : > { %p1100_p2 = por %p1099_p1, %p1098_p0 }
 0x1a7   : > { %p1101_p3 = pnand %p1100_p2, %p1094_p11 }
 0x1a9   : > { %1104 = shalt.err (!%p1101_p3)
}
 0x1aa   : > { %950 = dma.vmem_to_hbm [thread:$0]  (%p1241_p5), %s1648_s23, 128, %s1646_s26, %s791_s0  }
 0x1ab PF: > { %p956_p4 = scmp.ge.s32.totalorder %s1157_s10, 2  ;;  %s816_s16 = sand.u32 1, %s1137_s6  }
 0x1ac   : > { %s817_s20 = scalar_lea.sflag [#allocation8], %s816_s16 }
 0x1ad   : > { %p953_p6 = pnand %p956_p4, %p1248_p9 }
 0x1af   : > { %1132 = dma.done.wait (!%p953_p6), %s817_s20, 128  }
 0x1b0   : > { %1134 = vsyncadd (!%p953_p6), %s817_s20, 4294967168  ;;  %s32_s10 = sadd.s32 1, %s1157_s10   ;;  %s1737_s6 = smov %s1141_s7 }
 0x1b1   : > { %p29_p7 = scmp.ge.s32.totalorder %s32_s10, 4   ;;  %s1738_s7 = smov %s1145_s2 }
 0x1b2   : > { %s1739_s2 = smov %s1254_s18  ;;  %s1740_s8 = smov %s1153_s9 }
 0x1b3   : > { %s1741_s9 = smov %s1743_s13  ;;  %31 = sbr.rel (!%p29_p7) target bundleno = 39 (0x27), region = 74 }
 0x1ba   :  { %822 = vsyncpa [#allocation8], 1 }
 0x1bb   :  { %824 = vsyncpa [#allocation8 + $0x1], 1 }

</bundles_post_ra>
